<compile_context>
chip_gen: v5e
topology: v5e:2x2
jax: 0.10.0
libtpu: 0.0.40
codegen_flags: <defaults>
</compile_context>

<pallas_src>
import functools

import jax
import jax.numpy as jnp
from jax.experimental import pallas as pl
from jax.experimental.pallas import tpu as pltpu

IN_DIM = 8      # the PyTorch forward coerces the last dim to 8
HIDDEN = 32
SUBLANE = 8     # f32 sublane count of one vreg


# ---------------------------------------------------------------------------
# Fused Pallas kernel: encoder Linear + LSTM recurrence + last-step select
# ---------------------------------------------------------------------------
def _fused_lstm_kernel(x_ref, enc_w_ref, enc_b_ref, w_ih_ref, b_ih_ref,
                       w_hh_ref, b_hh_ref, o_ref, *, seq_len, batch_pad,
                       hidden):
    S, Bp, H = seq_len, batch_pad, hidden

    # Fold the encoder Linear into the input-side LSTM projection (one tiny
    # (8,32)@(32,128) matmul) so all S*Bp rows need only ONE matmul below.
    w_fused = jnp.dot(enc_w_ref[...], w_ih_ref[...],
                      preferred_element_type=jnp.float32)           # (8, 4H)
    b_fused = (jnp.dot(enc_b_ref[...], w_ih_ref[...],
                       preferred_element_type=jnp.float32)
               + b_ih_ref[...] + b_hh_ref[...])                     # (1, 4H)

    # Input-side gate pre-activations for ALL timesteps, time-major rows
    # (row t*Bp + b), lane-dense 4H = 128 gate axis.
    xg = (jnp.dot(x_ref[...], w_fused,
                  preferred_element_type=jnp.float32) + b_fused)    # (S*Bp, 4H)

    w_hh = w_hh_ref[...]                                            # (H, 4H)

    def sigmoid(z):
        return 1.0 / (1.0 + jnp.exp(-z))

    h = jnp.zeros((Bp, H), jnp.float32)
    c = jnp.zeros((Bp, H), jnp.float32)

    # Inherently sequential recurrence; S is small and static -> unroll.
    # Bp % 8 == 0, so each slice is a whole sublane-aligned tile.
    for t in range(S):
        gates = xg[t * Bp:(t + 1) * Bp, :] + jnp.dot(
            h, w_hh, preferred_element_type=jnp.float32)            # (Bp, 4H)
        i_g = sigmoid(gates[:, 0 * H:1 * H])
        f_g = sigmoid(gates[:, 1 * H:2 * H])
        g_g = jnp.tanh(gates[:, 2 * H:3 * H])
        o_g = sigmoid(gates[:, 3 * H:4 * H])
        c = f_g * c + i_g * g_g
        h = o_g * jnp.tanh(c)

    o_ref[...] = h.astype(o_ref.dtype)                              # last-step hidden


# ---------------------------------------------------------------------------
# Wrapper
# ---------------------------------------------------------------------------
def _coerce_input(x):
    """Match the PyTorch forward: zero-pad / truncate last dim to 8."""
    d = x.shape[-1]
    if d < IN_DIM:
        pad = jnp.zeros((*x.shape[:-1], IN_DIM - d), x.dtype)
        x = jnp.concatenate([x, pad], axis=-1)
    elif d > IN_DIM:
        x = x[..., :IN_DIM]
    return x


@jax.jit
def lstm_embedding_forward(x, params):
    x = _coerce_input(x).astype(jnp.float32)
    B, S, _ = x.shape
    Bp = ((B + SUBLANE - 1) // SUBLANE) * SUBLANE                   # sublane pad

    # Time-major flatten (row = t*Bp + b) with batch padded to a multiple of
    # 8, so every per-step slice inside the kernel is a static, sublane- and
    # lane-aligned tile.  Tiny; done once at the kernel boundary.
    x_tm = (jnp.zeros((S, Bp, IN_DIM), jnp.float32)
            .at[:, :B, :].set(x.transpose(1, 0, 2))
            .reshape(S * Bp, IN_DIM))

    kernel = functools.partial(_fused_lstm_kernel,
                               seq_len=S, batch_pad=Bp, hidden=HIDDEN)
    vmem_spec = pl.BlockSpec(memory_space=pltpu.MemorySpace.VMEM)
    out = pl.pallas_call(
        kernel,
        out_shape=jax.ShapeDtypeStruct((Bp, HIDDEN), jnp.float32),
        in_specs=[vmem_spec] * 7,
        out_specs=vmem_spec,
    )(x_tm, params["enc_w"], params["enc_b"], params["w_ih"], params["b_ih"],
      params["w_hh"], params["b_hh"])
    return out[:B]                                                  # drop pad rows


# ---------------------------------------------------------------------------
# Parameters (deterministic, synthetic)
# ---------------------------------------------------------------------------
def init_params(key, input_dim=IN_DIM, hidden=HIDDEN):
    ks = jax.random.split(key, 6)

    def nrm(k, shape, scale=0.05):
        return scale * jax.random.normal(k, shape, dtype=jnp.float32)

    return {
        "enc_w": nrm(ks[0], (input_dim, hidden)),
        "enc_b": nrm(ks[1], (1, hidden)),
        # LSTM weights stored transposed (in_features, 4*hidden), PyTorch gate
        # order [i, f, g, o].
        "w_ih": nrm(ks[2], (hidden, 4 * hidden)),
        "b_ih": nrm(ks[3], (1, 4 * hidden)),
        "w_hh": nrm(ks[4], (hidden, 4 * hidden)),
        "b_hh": nrm(ks[5], (1, 4 * hidden)),
        # NOTE: the PyTorch module's self.decoder Linear(32, 8) is unused in
        # forward() and therefore omitted.
    }


# ---------------------------------------------------------------------------
# Pure-JAX reference (correctness check)
# ---------------------------------------------------------------------------
def _reference_forward(x, params):
    x = _coerce_input(x).astype(jnp.float32)
    B, S, _ = x.shape
    H = HIDDEN
    xe = x @ params["enc_w"] + params["enc_b"][0]                   # (B, S, H)

    def step(carry, xt):
        h, c = carry
        gates = (xt @ params["w_ih"] + params["b_ih"][0]
                 + h @ params["w_hh"] + params["b_hh"][0])
        i_g = jax.nn.sigmoid(gates[:, 0 * H:1 * H])
        f_g = jax.nn.sigmoid(gates[:, 1 * H:2 * H])
        g_g = jnp.tanh(gates[:, 2 * H:3 * H])
        o_g = jax.nn.sigmoid(gates[:, 3 * H:4 * H])
        c = f_g * c + i_g * g_g
        h = o_g * jnp.tanh(c)
        return (h, c), None

    h0 = jnp.zeros((B, H), jnp.float32)
    c0 = jnp.zeros((B, H), jnp.float32)
    (h, _), _ = jax.lax.scan(step, (h0, c0), xe.transpose(1, 0, 2))
    return h


# ---------------------------------------------------------------------------
if __name__ == "__main__":
    B, S, D = 2, 8, 8   # batch=2, seq=8, input features=8 (module default)

    key = jax.random.PRNGKey(0)
    k_x, k_p = jax.random.split(key)
    x = jax.random.normal(k_x, (B, S, D), dtype=jnp.float32)
    params = init_params(k_p)

    out = jax.block_until_ready(lstm_embedding_forward(x, params))

    assert out.shape == (B, HIDDEN), out.shape
    assert bool(jnp.all(jnp.isfinite(out)))

    ref = _reference_forward(x, params)
    assert bool(jnp.allclose(out, ref, rtol=2e-3, atol=2e-3)), \
        float(jnp.max(jnp.abs(out - ref)))

    print("KERNEL_OK")
</pallas_src>

<mosaic_0001>
module attributes {stable_mosaic.version = 11 : i64} {
  func.func @_fused_lstm_kernel(%arg0: memref<64x8xf32, #tpu.memory_space<vmem>>, %arg1: memref<8x32xf32, #tpu.memory_space<vmem>>, %arg2: memref<1x32xf32, #tpu.memory_space<vmem>>, %arg3: memref<32x128xf32, #tpu.memory_space<vmem>>, %arg4: memref<1x128xf32, #tpu.memory_space<vmem>>, %arg5: memref<32x128xf32, #tpu.memory_space<vmem>>, %arg6: memref<1x128xf32, #tpu.memory_space<vmem>>, %arg7: memref<8x32xf32, #tpu.memory_space<vmem>>) attributes {dimension_semantics = [], scalar_prefetch = 0 : i64, scratch_operands = 0 : i64, tpu.core_type = #tpu.core_type<tc>} {
    %c0 = arith.constant 0 : index
    %c0_0 = arith.constant 0 : index
    %0 = vector.load %arg1[%c0, %c0_0] : memref<8x32xf32, #tpu.memory_space<vmem>>, vector<8x32xf32>
    %c0_1 = arith.constant 0 : index
    %c0_2 = arith.constant 0 : index
    %1 = vector.load %arg3[%c0_1, %c0_2] : memref<32x128xf32, #tpu.memory_space<vmem>>, vector<32x128xf32>
    %cst = arith.constant dense<0.000000e+00> : vector<8x128xf32>
    %2 = tpu.matmul %0, %1, %cst {dimension_numbers = #tpu.dot_dimension_numbers<[1], [0], [0], [1], [0, 0, 1, 1], [], []>} : vector<8x32xf32>, vector<32x128xf32>, vector<8x128xf32> -> vector<8x128xf32>
    %c0_3 = arith.constant 0 : index
    %c0_4 = arith.constant 0 : index
    %3 = vector.load %arg2[%c0_3, %c0_4] : memref<1x32xf32, #tpu.memory_space<vmem>>, vector<1x32xf32>
    %c0_5 = arith.constant 0 : index
    %c0_6 = arith.constant 0 : index
    %4 = vector.load %arg3[%c0_5, %c0_6] : memref<32x128xf32, #tpu.memory_space<vmem>>, vector<32x128xf32>
    %cst_7 = arith.constant dense<0.000000e+00> : vector<1x128xf32>
    %5 = tpu.matmul %3, %4, %cst_7 {dimension_numbers = #tpu.dot_dimension_numbers<[1], [0], [0], [1], [0, 0, 1, 1], [], []>} : vector<1x32xf32>, vector<32x128xf32>, vector<1x128xf32> -> vector<1x128xf32>
    %c0_8 = arith.constant 0 : index
    %c0_9 = arith.constant 0 : index
    %6 = vector.load %arg4[%c0_8, %c0_9] : memref<1x128xf32, #tpu.memory_space<vmem>>, vector<1x128xf32>
    %7 = arith.addf %5, %6 : vector<1x128xf32>
    %c0_10 = arith.constant 0 : index
    %c0_11 = arith.constant 0 : index
    %8 = vector.load %arg6[%c0_10, %c0_11] : memref<1x128xf32, #tpu.memory_space<vmem>>, vector<1x128xf32>
    %9 = arith.addf %7, %8 : vector<1x128xf32>
    %c0_12 = arith.constant 0 : index
    %c0_13 = arith.constant 0 : index
    %10 = vector.load %arg0[%c0_12, %c0_13] : memref<64x8xf32, #tpu.memory_space<vmem>>, vector<64x8xf32>
    %cst_14 = arith.constant dense<0.000000e+00> : vector<64x128xf32>
    %11 = tpu.matmul %10, %2, %cst_14 {dimension_numbers = #tpu.dot_dimension_numbers<[1], [0], [0], [1], [0, 0, 1, 1], [], []>} : vector<64x8xf32>, vector<8x128xf32>, vector<64x128xf32> -> vector<64x128xf32>
    %12 = vector.broadcast %9 : vector<1x128xf32> to vector<64x128xf32>
    %13 = arith.addf %11, %12 : vector<64x128xf32>
    %c0_15 = arith.constant 0 : index
    %c0_16 = arith.constant 0 : index
    %14 = vector.load %arg5[%c0_15, %c0_16] : memref<32x128xf32, #tpu.memory_space<vmem>>, vector<32x128xf32>
    %cst_17 = arith.constant 0.000000e+00 : f32
    %15 = vector.broadcast %cst_17 : f32 to vector<8x32xf32>
    %cst_18 = arith.constant 0.000000e+00 : f32
    %16 = vector.broadcast %cst_18 : f32 to vector<8x32xf32>
    %17 = vector.extract_strided_slice %13 {offsets = [0, 0], sizes = [8, 128], strides = [1, 1]} : vector<64x128xf32> to vector<8x128xf32>
    %cst_19 = arith.constant dense<0.000000e+00> : vector<8x128xf32>
    %18 = tpu.matmul %15, %14, %cst_19 {dimension_numbers = #tpu.dot_dimension_numbers<[1], [0], [0], [1], [0, 0, 1, 1], [], []>} : vector<8x32xf32>, vector<32x128xf32>, vector<8x128xf32> -> vector<8x128xf32>
    %19 = arith.addf %17, %18 : vector<8x128xf32>
    %20 = vector.extract_strided_slice %19 {offsets = [0, 0], sizes = [8, 32], strides = [1, 1]} : vector<8x128xf32> to vector<8x32xf32>
    %cst_20 = arith.constant 0.000000e+00 : f32
    %21 = vector.broadcast %cst_20 : f32 to vector<8x32xf32>
    %22 = arith.subf %21, %20 : vector<8x32xf32>
    %23 = math.exp %22 : vector<8x32xf32>
    %cst_21 = arith.constant 1.000000e+00 : f32
    %24 = vector.broadcast %cst_21 : f32 to vector<8x32xf32>
    %25 = arith.addf %24, %23 : vector<8x32xf32>
    %cst_22 = arith.constant 1.000000e+00 : f32
    %26 = vector.broadcast %cst_22 : f32 to vector<8x32xf32>
    %27 = arith.divf %26, %25 : vector<8x32xf32>
    %28 = vector.extract_strided_slice %19 {offsets = [0, 32], sizes = [8, 32], strides = [1, 1]} : vector<8x128xf32> to vector<8x32xf32>
    %cst_23 = arith.constant 0.000000e+00 : f32
    %29 = vector.broadcast %cst_23 : f32 to vector<8x32xf32>
    %30 = arith.subf %29, %28 : vector<8x32xf32>
    %31 = math.exp %30 : vector<8x32xf32>
    %cst_24 = arith.constant 1.000000e+00 : f32
    %32 = vector.broadcast %cst_24 : f32 to vector<8x32xf32>
    %33 = arith.addf %32, %31 : vector<8x32xf32>
    %cst_25 = arith.constant 1.000000e+00 : f32
    %34 = vector.broadcast %cst_25 : f32 to vector<8x32xf32>
    %35 = arith.divf %34, %33 : vector<8x32xf32>
    %36 = vector.extract_strided_slice %19 {offsets = [0, 64], sizes = [8, 32], strides = [1, 1]} : vector<8x128xf32> to vector<8x32xf32>
    %37 = math.tanh %36 : vector<8x32xf32>
    %38 = vector.extract_strided_slice %19 {offsets = [0, 96], sizes = [8, 32], strides = [1, 1]} : vector<8x128xf32> to vector<8x32xf32>
    %cst_26 = arith.constant 0.000000e+00 : f32
    %39 = vector.broadcast %cst_26 : f32 to vector<8x32xf32>
    %40 = arith.subf %39, %38 : vector<8x32xf32>
    %41 = math.exp %40 : vector<8x32xf32>
    %cst_27 = arith.constant 1.000000e+00 : f32
    %42 = vector.broadcast %cst_27 : f32 to vector<8x32xf32>
    %43 = arith.addf %42, %41 : vector<8x32xf32>
    %cst_28 = arith.constant 1.000000e+00 : f32
    %44 = vector.broadcast %cst_28 : f32 to vector<8x32xf32>
    %45 = arith.divf %44, %43 : vector<8x32xf32>
    %46 = arith.mulf %35, %16 : vector<8x32xf32>
    %47 = arith.mulf %27, %37 : vector<8x32xf32>
    %48 = arith.addf %46, %47 : vector<8x32xf32>
    %49 = math.tanh %48 : vector<8x32xf32>
    %50 = arith.mulf %45, %49 : vector<8x32xf32>
    %51 = vector.extract_strided_slice %13 {offsets = [8, 0], sizes = [8, 128], strides = [1, 1]} : vector<64x128xf32> to vector<8x128xf32>
    %cst_29 = arith.constant dense<0.000000e+00> : vector<8x128xf32>
    %52 = tpu.matmul %50, %14, %cst_29 {dimension_numbers = #tpu.dot_dimension_numbers<[1], [0], [0], [1], [0, 0, 1, 1], [], []>} : vector<8x32xf32>, vector<32x128xf32>, vector<8x128xf32> -> vector<8x128xf32>
    %53 = arith.addf %51, %52 : vector<8x128xf32>
    %54 = vector.extract_strided_slice %53 {offsets = [0, 0], sizes = [8, 32], strides = [1, 1]} : vector<8x128xf32> to vector<8x32xf32>
    %cst_30 = arith.constant 0.000000e+00 : f32
    %55 = vector.broadcast %cst_30 : f32 to vector<8x32xf32>
    %56 = arith.subf %55, %54 : vector<8x32xf32>
    %57 = math.exp %56 : vector<8x32xf32>
    %cst_31 = arith.constant 1.000000e+00 : f32
    %58 = vector.broadcast %cst_31 : f32 to vector<8x32xf32>
    %59 = arith.addf %58, %57 : vector<8x32xf32>
    %cst_32 = arith.constant 1.000000e+00 : f32
    %60 = vector.broadcast %cst_32 : f32 to vector<8x32xf32>
    %61 = arith.divf %60, %59 : vector<8x32xf32>
    %62 = vector.extract_strided_slice %53 {offsets = [0, 32], sizes = [8, 32], strides = [1, 1]} : vector<8x128xf32> to vector<8x32xf32>
    %cst_33 = arith.constant 0.000000e+00 : f32
    %63 = vector.broadcast %cst_33 : f32 to vector<8x32xf32>
    %64 = arith.subf %63, %62 : vector<8x32xf32>
    %65 = math.exp %64 : vector<8x32xf32>
    %cst_34 = arith.constant 1.000000e+00 : f32
    %66 = vector.broadcast %cst_34 : f32 to vector<8x32xf32>
    %67 = arith.addf %66, %65 : vector<8x32xf32>
    %cst_35 = arith.constant 1.000000e+00 : f32
    %68 = vector.broadcast %cst_35 : f32 to vector<8x32xf32>
    %69 = arith.divf %68, %67 : vector<8x32xf32>
    %70 = vector.extract_strided_slice %53 {offsets = [0, 64], sizes = [8, 32], strides = [1, 1]} : vector<8x128xf32> to vector<8x32xf32>
    %71 = math.tanh %70 : vector<8x32xf32>
    %72 = vector.extract_strided_slice %53 {offsets = [0, 96], sizes = [8, 32], strides = [1, 1]} : vector<8x128xf32> to vector<8x32xf32>
    %cst_36 = arith.constant 0.000000e+00 : f32
    %73 = vector.broadcast %cst_36 : f32 to vector<8x32xf32>
    %74 = arith.subf %73, %72 : vector<8x32xf32>
    %75 = math.exp %74 : vector<8x32xf32>
    %cst_37 = arith.constant 1.000000e+00 : f32
    %76 = vector.broadcast %cst_37 : f32 to vector<8x32xf32>
    %77 = arith.addf %76, %75 : vector<8x32xf32>
    %cst_38 = arith.constant 1.000000e+00 : f32
    %78 = vector.broadcast %cst_38 : f32 to vector<8x32xf32>
    %79 = arith.divf %78, %77 : vector<8x32xf32>
    %80 = arith.mulf %69, %48 : vector<8x32xf32>
    %81 = arith.mulf %61, %71 : vector<8x32xf32>
    %82 = arith.addf %80, %81 : vector<8x32xf32>
    %83 = math.tanh %82 : vector<8x32xf32>
    %84 = arith.mulf %79, %83 : vector<8x32xf32>
    %85 = vector.extract_strided_slice %13 {offsets = [16, 0], sizes = [8, 128], strides = [1, 1]} : vector<64x128xf32> to vector<8x128xf32>
    %cst_39 = arith.constant dense<0.000000e+00> : vector<8x128xf32>
    %86 = tpu.matmul %84, %14, %cst_39 {dimension_numbers = #tpu.dot_dimension_numbers<[1], [0], [0], [1], [0, 0, 1, 1], [], []>} : vector<8x32xf32>, vector<32x128xf32>, vector<8x128xf32> -> vector<8x128xf32>
    %87 = arith.addf %85, %86 : vector<8x128xf32>
    %88 = vector.extract_strided_slice %87 {offsets = [0, 0], sizes = [8, 32], strides = [1, 1]} : vector<8x128xf32> to vector<8x32xf32>
    %cst_40 = arith.constant 0.000000e+00 : f32
    %89 = vector.broadcast %cst_40 : f32 to vector<8x32xf32>
    %90 = arith.subf %89, %88 : vector<8x32xf32>
    %91 = math.exp %90 : vector<8x32xf32>
    %cst_41 = arith.constant 1.000000e+00 : f32
    %92 = vector.broadcast %cst_41 : f32 to vector<8x32xf32>
    %93 = arith.addf %92, %91 : vector<8x32xf32>
    %cst_42 = arith.constant 1.000000e+00 : f32
    %94 = vector.broadcast %cst_42 : f32 to vector<8x32xf32>
    %95 = arith.divf %94, %93 : vector<8x32xf32>
    %96 = vector.extract_strided_slice %87 {offsets = [0, 32], sizes = [8, 32], strides = [1, 1]} : vector<8x128xf32> to vector<8x32xf32>
    %cst_43 = arith.constant 0.000000e+00 : f32
    %97 = vector.broadcast %cst_43 : f32 to vector<8x32xf32>
    %98 = arith.subf %97, %96 : vector<8x32xf32>
    %99 = math.exp %98 : vector<8x32xf32>
    %cst_44 = arith.constant 1.000000e+00 : f32
    %100 = vector.broadcast %cst_44 : f32 to vector<8x32xf32>
    %101 = arith.addf %100, %99 : vector<8x32xf32>
    %cst_45 = arith.constant 1.000000e+00 : f32
    %102 = vector.broadcast %cst_45 : f32 to vector<8x32xf32>
    %103 = arith.divf %102, %101 : vector<8x32xf32>
    %104 = vector.extract_strided_slice %87 {offsets = [0, 64], sizes = [8, 32], strides = [1, 1]} : vector<8x128xf32> to vector<8x32xf32>
    %105 = math.tanh %104 : vector<8x32xf32>
    %106 = vector.extract_strided_slice %87 {offsets = [0, 96], sizes = [8, 32], strides = [1, 1]} : vector<8x128xf32> to vector<8x32xf32>
    %cst_46 = arith.constant 0.000000e+00 : f32
    %107 = vector.broadcast %cst_46 : f32 to vector<8x32xf32>
    %108 = arith.subf %107, %106 : vector<8x32xf32>
    %109 = math.exp %108 : vector<8x32xf32>
    %cst_47 = arith.constant 1.000000e+00 : f32
    %110 = vector.broadcast %cst_47 : f32 to vector<8x32xf32>
    %111 = arith.addf %110, %109 : vector<8x32xf32>
    %cst_48 = arith.constant 1.000000e+00 : f32
    %112 = vector.broadcast %cst_48 : f32 to vector<8x32xf32>
    %113 = arith.divf %112, %111 : vector<8x32xf32>
    %114 = arith.mulf %103, %82 : vector<8x32xf32>
    %115 = arith.mulf %95, %105 : vector<8x32xf32>
    %116 = arith.addf %114, %115 : vector<8x32xf32>
    %117 = math.tanh %116 : vector<8x32xf32>
    %118 = arith.mulf %113, %117 : vector<8x32xf32>
    %119 = vector.extract_strided_slice %13 {offsets = [24, 0], sizes = [8, 128], strides = [1, 1]} : vector<64x128xf32> to vector<8x128xf32>
    %cst_49 = arith.constant dense<0.000000e+00> : vector<8x128xf32>
    %120 = tpu.matmul %118, %14, %cst_49 {dimension_numbers = #tpu.dot_dimension_numbers<[1], [0], [0], [1], [0, 0, 1, 1], [], []>} : vector<8x32xf32>, vector<32x128xf32>, vector<8x128xf32> -> vector<8x128xf32>
    %121 = arith.addf %119, %120 : vector<8x128xf32>
    %122 = vector.extract_strided_slice %121 {offsets = [0, 0], sizes = [8, 32], strides = [1, 1]} : vector<8x128xf32> to vector<8x32xf32>
    %cst_50 = arith.constant 0.000000e+00 : f32
    %123 = vector.broadcast %cst_50 : f32 to vector<8x32xf32>
    %124 = arith.subf %123, %122 : vector<8x32xf32>
    %125 = math.exp %124 : vector<8x32xf32>
    %cst_51 = arith.constant 1.000000e+00 : f32
    %126 = vector.broadcast %cst_51 : f32 to vector<8x32xf32>
    %127 = arith.addf %126, %125 : vector<8x32xf32>
    %cst_52 = arith.constant 1.000000e+00 : f32
    %128 = vector.broadcast %cst_52 : f32 to vector<8x32xf32>
    %129 = arith.divf %128, %127 : vector<8x32xf32>
    %130 = vector.extract_strided_slice %121 {offsets = [0, 32], sizes = [8, 32], strides = [1, 1]} : vector<8x128xf32> to vector<8x32xf32>
    %cst_53 = arith.constant 0.000000e+00 : f32
    %131 = vector.broadcast %cst_53 : f32 to vector<8x32xf32>
    %132 = arith.subf %131, %130 : vector<8x32xf32>
    %133 = math.exp %132 : vector<8x32xf32>
    %cst_54 = arith.constant 1.000000e+00 : f32
    %134 = vector.broadcast %cst_54 : f32 to vector<8x32xf32>
    %135 = arith.addf %134, %133 : vector<8x32xf32>
    %cst_55 = arith.constant 1.000000e+00 : f32
    %136 = vector.broadcast %cst_55 : f32 to vector<8x32xf32>
    %137 = arith.divf %136, %135 : vector<8x32xf32>
    %138 = vector.extract_strided_slice %121 {offsets = [0, 64], sizes = [8, 32], strides = [1, 1]} : vector<8x128xf32> to vector<8x32xf32>
    %139 = math.tanh %138 : vector<8x32xf32>
    %140 = vector.extract_strided_slice %121 {offsets = [0, 96], sizes = [8, 32], strides = [1, 1]} : vector<8x128xf32> to vector<8x32xf32>
    %cst_56 = arith.constant 0.000000e+00 : f32
    %141 = vector.broadcast %cst_56 : f32 to vector<8x32xf32>
    %142 = arith.subf %141, %140 : vector<8x32xf32>
    %143 = math.exp %142 : vector<8x32xf32>
    %cst_57 = arith.constant 1.000000e+00 : f32
    %144 = vector.broadcast %cst_57 : f32 to vector<8x32xf32>
    %145 = arith.addf %144, %143 : vector<8x32xf32>
    %cst_58 = arith.constant 1.000000e+00 : f32
    %146 = vector.broadcast %cst_58 : f32 to vector<8x32xf32>
    %147 = arith.divf %146, %145 : vector<8x32xf32>
    %148 = arith.mulf %137, %116 : vector<8x32xf32>
    %149 = arith.mulf %129, %139 : vector<8x32xf32>
    %150 = arith.addf %148, %149 : vector<8x32xf32>
    %151 = math.tanh %150 : vector<8x32xf32>
    %152 = arith.mulf %147, %151 : vector<8x32xf32>
    %153 = vector.extract_strided_slice %13 {offsets = [32, 0], sizes = [8, 128], strides = [1, 1]} : vector<64x128xf32> to vector<8x128xf32>
    %cst_59 = arith.constant dense<0.000000e+00> : vector<8x128xf32>
    %154 = tpu.matmul %152, %14, %cst_59 {dimension_numbers = #tpu.dot_dimension_numbers<[1], [0], [0], [1], [0, 0, 1, 1], [], []>} : vector<8x32xf32>, vector<32x128xf32>, vector<8x128xf32> -> vector<8x128xf32>
    %155 = arith.addf %153, %154 : vector<8x128xf32>
    %156 = vector.extract_strided_slice %155 {offsets = [0, 0], sizes = [8, 32], strides = [1, 1]} : vector<8x128xf32> to vector<8x32xf32>
    %cst_60 = arith.constant 0.000000e+00 : f32
    %157 = vector.broadcast %cst_60 : f32 to vector<8x32xf32>
    %158 = arith.subf %157, %156 : vector<8x32xf32>
    %159 = math.exp %158 : vector<8x32xf32>
    %cst_61 = arith.constant 1.000000e+00 : f32
    %160 = vector.broadcast %cst_61 : f32 to vector<8x32xf32>
    %161 = arith.addf %160, %159 : vector<8x32xf32>
    %cst_62 = arith.constant 1.000000e+00 : f32
    %162 = vector.broadcast %cst_62 : f32 to vector<8x32xf32>
    %163 = arith.divf %162, %161 : vector<8x32xf32>
    %164 = vector.extract_strided_slice %155 {offsets = [0, 32], sizes = [8, 32], strides = [1, 1]} : vector<8x128xf32> to vector<8x32xf32>
    %cst_63 = arith.constant 0.000000e+00 : f32
    %165 = vector.broadcast %cst_63 : f32 to vector<8x32xf32>
    %166 = arith.subf %165, %164 : vector<8x32xf32>
    %167 = math.exp %166 : vector<8x32xf32>
    %cst_64 = arith.constant 1.000000e+00 : f32
    %168 = vector.broadcast %cst_64 : f32 to vector<8x32xf32>
    %169 = arith.addf %168, %167 : vector<8x32xf32>
    %cst_65 = arith.constant 1.000000e+00 : f32
    %170 = vector.broadcast %cst_65 : f32 to vector<8x32xf32>
    %171 = arith.divf %170, %169 : vector<8x32xf32>
    %172 = vector.extract_strided_slice %155 {offsets = [0, 64], sizes = [8, 32], strides = [1, 1]} : vector<8x128xf32> to vector<8x32xf32>
    %173 = math.tanh %172 : vector<8x32xf32>
    %174 = vector.extract_strided_slice %155 {offsets = [0, 96], sizes = [8, 32], strides = [1, 1]} : vector<8x128xf32> to vector<8x32xf32>
    %cst_66 = arith.constant 0.000000e+00 : f32
    %175 = vector.broadcast %cst_66 : f32 to vector<8x32xf32>
    %176 = arith.subf %175, %174 : vector<8x32xf32>
    %177 = math.exp %176 : vector<8x32xf32>
    %cst_67 = arith.constant 1.000000e+00 : f32
    %178 = vector.broadcast %cst_67 : f32 to vector<8x32xf32>
    %179 = arith.addf %178, %177 : vector<8x32xf32>
    %cst_68 = arith.constant 1.000000e+00 : f32
    %180 = vector.broadcast %cst_68 : f32 to vector<8x32xf32>
    %181 = arith.divf %180, %179 : vector<8x32xf32>
    %182 = arith.mulf %171, %150 : vector<8x32xf32>
    %183 = arith.mulf %163, %173 : vector<8x32xf32>
    %184 = arith.addf %182, %183 : vector<8x32xf32>
    %185 = math.tanh %184 : vector<8x32xf32>
    %186 = arith.mulf %181, %185 : vector<8x32xf32>
    %187 = vector.extract_strided_slice %13 {offsets = [40, 0], sizes = [8, 128], strides = [1, 1]} : vector<64x128xf32> to vector<8x128xf32>
    %cst_69 = arith.constant dense<0.000000e+00> : vector<8x128xf32>
    %188 = tpu.matmul %186, %14, %cst_69 {dimension_numbers = #tpu.dot_dimension_numbers<[1], [0], [0], [1], [0, 0, 1, 1], [], []>} : vector<8x32xf32>, vector<32x128xf32>, vector<8x128xf32> -> vector<8x128xf32>
    %189 = arith.addf %187, %188 : vector<8x128xf32>
    %190 = vector.extract_strided_slice %189 {offsets = [0, 0], sizes = [8, 32], strides = [1, 1]} : vector<8x128xf32> to vector<8x32xf32>
    %cst_70 = arith.constant 0.000000e+00 : f32
    %191 = vector.broadcast %cst_70 : f32 to vector<8x32xf32>
    %192 = arith.subf %191, %190 : vector<8x32xf32>
    %193 = math.exp %192 : vector<8x32xf32>
    %cst_71 = arith.constant 1.000000e+00 : f32
    %194 = vector.broadcast %cst_71 : f32 to vector<8x32xf32>
    %195 = arith.addf %194, %193 : vector<8x32xf32>
    %cst_72 = arith.constant 1.000000e+00 : f32
    %196 = vector.broadcast %cst_72 : f32 to vector<8x32xf32>
    %197 = arith.divf %196, %195 : vector<8x32xf32>
    %198 = vector.extract_strided_slice %189 {offsets = [0, 32], sizes = [8, 32], strides = [1, 1]} : vector<8x128xf32> to vector<8x32xf32>
    %cst_73 = arith.constant 0.000000e+00 : f32
    %199 = vector.broadcast %cst_73 : f32 to vector<8x32xf32>
    %200 = arith.subf %199, %198 : vector<8x32xf32>
    %201 = math.exp %200 : vector<8x32xf32>
    %cst_74 = arith.constant 1.000000e+00 : f32
    %202 = vector.broadcast %cst_74 : f32 to vector<8x32xf32>
    %203 = arith.addf %202, %201 : vector<8x32xf32>
    %cst_75 = arith.constant 1.000000e+00 : f32
    %204 = vector.broadcast %cst_75 : f32 to vector<8x32xf32>
    %205 = arith.divf %204, %203 : vector<8x32xf32>
    %206 = vector.extract_strided_slice %189 {offsets = [0, 64], sizes = [8, 32], strides = [1, 1]} : vector<8x128xf32> to vector<8x32xf32>
    %207 = math.tanh %206 : vector<8x32xf32>
    %208 = vector.extract_strided_slice %189 {offsets = [0, 96], sizes = [8, 32], strides = [1, 1]} : vector<8x128xf32> to vector<8x32xf32>
    %cst_76 = arith.constant 0.000000e+00 : f32
    %209 = vector.broadcast %cst_76 : f32 to vector<8x32xf32>
    %210 = arith.subf %209, %208 : vector<8x32xf32>
    %211 = math.exp %210 : vector<8x32xf32>
    %cst_77 = arith.constant 1.000000e+00 : f32
    %212 = vector.broadcast %cst_77 : f32 to vector<8x32xf32>
    %213 = arith.addf %212, %211 : vector<8x32xf32>
    %cst_78 = arith.constant 1.000000e+00 : f32
    %214 = vector.broadcast %cst_78 : f32 to vector<8x32xf32>
    %215 = arith.divf %214, %213 : vector<8x32xf32>
    %216 = arith.mulf %205, %184 : vector<8x32xf32>
    %217 = arith.mulf %197, %207 : vector<8x32xf32>
    %218 = arith.addf %216, %217 : vector<8x32xf32>
    %219 = math.tanh %218 : vector<8x32xf32>
    %220 = arith.mulf %215, %219 : vector<8x32xf32>
    %221 = vector.extract_strided_slice %13 {offsets = [48, 0], sizes = [8, 128], strides = [1, 1]} : vector<64x128xf32> to vector<8x128xf32>
    %cst_79 = arith.constant dense<0.000000e+00> : vector<8x128xf32>
    %222 = tpu.matmul %220, %14, %cst_79 {dimension_numbers = #tpu.dot_dimension_numbers<[1], [0], [0], [1], [0, 0, 1, 1], [], []>} : vector<8x32xf32>, vector<32x128xf32>, vector<8x128xf32> -> vector<8x128xf32>
    %223 = arith.addf %221, %222 : vector<8x128xf32>
    %224 = vector.extract_strided_slice %223 {offsets = [0, 0], sizes = [8, 32], strides = [1, 1]} : vector<8x128xf32> to vector<8x32xf32>
    %cst_80 = arith.constant 0.000000e+00 : f32
    %225 = vector.broadcast %cst_80 : f32 to vector<8x32xf32>
    %226 = arith.subf %225, %224 : vector<8x32xf32>
    %227 = math.exp %226 : vector<8x32xf32>
    %cst_81 = arith.constant 1.000000e+00 : f32
    %228 = vector.broadcast %cst_81 : f32 to vector<8x32xf32>
    %229 = arith.addf %228, %227 : vector<8x32xf32>
    %cst_82 = arith.constant 1.000000e+00 : f32
    %230 = vector.broadcast %cst_82 : f32 to vector<8x32xf32>
    %231 = arith.divf %230, %229 : vector<8x32xf32>
    %232 = vector.extract_strided_slice %223 {offsets = [0, 32], sizes = [8, 32], strides = [1, 1]} : vector<8x128xf32> to vector<8x32xf32>
    %cst_83 = arith.constant 0.000000e+00 : f32
    %233 = vector.broadcast %cst_83 : f32 to vector<8x32xf32>
    %234 = arith.subf %233, %232 : vector<8x32xf32>
    %235 = math.exp %234 : vector<8x32xf32>
    %cst_84 = arith.constant 1.000000e+00 : f32
    %236 = vector.broadcast %cst_84 : f32 to vector<8x32xf32>
    %237 = arith.addf %236, %235 : vector<8x32xf32>
    %cst_85 = arith.constant 1.000000e+00 : f32
    %238 = vector.broadcast %cst_85 : f32 to vector<8x32xf32>
    %239 = arith.divf %238, %237 : vector<8x32xf32>
    %240 = vector.extract_strided_slice %223 {offsets = [0, 64], sizes = [8, 32], strides = [1, 1]} : vector<8x128xf32> to vector<8x32xf32>
    %241 = math.tanh %240 : vector<8x32xf32>
    %242 = vector.extract_strided_slice %223 {offsets = [0, 96], sizes = [8, 32], strides = [1, 1]} : vector<8x128xf32> to vector<8x32xf32>
    %cst_86 = arith.constant 0.000000e+00 : f32
    %243 = vector.broadcast %cst_86 : f32 to vector<8x32xf32>
    %244 = arith.subf %243, %242 : vector<8x32xf32>
    %245 = math.exp %244 : vector<8x32xf32>
    %cst_87 = arith.constant 1.000000e+00 : f32
    %246 = vector.broadcast %cst_87 : f32 to vector<8x32xf32>
    %247 = arith.addf %246, %245 : vector<8x32xf32>
    %cst_88 = arith.constant 1.000000e+00 : f32
    %248 = vector.broadcast %cst_88 : f32 to vector<8x32xf32>
    %249 = arith.divf %248, %247 : vector<8x32xf32>
    %250 = arith.mulf %239, %218 : vector<8x32xf32>
    %251 = arith.mulf %231, %241 : vector<8x32xf32>
    %252 = arith.addf %250, %251 : vector<8x32xf32>
    %253 = math.tanh %252 : vector<8x32xf32>
    %254 = arith.mulf %249, %253 : vector<8x32xf32>
    %255 = vector.extract_strided_slice %13 {offsets = [56, 0], sizes = [8, 128], strides = [1, 1]} : vector<64x128xf32> to vector<8x128xf32>
    %cst_89 = arith.constant dense<0.000000e+00> : vector<8x128xf32>
    %256 = tpu.matmul %254, %14, %cst_89 {dimension_numbers = #tpu.dot_dimension_numbers<[1], [0], [0], [1], [0, 0, 1, 1], [], []>} : vector<8x32xf32>, vector<32x128xf32>, vector<8x128xf32> -> vector<8x128xf32>
    %257 = arith.addf %255, %256 : vector<8x128xf32>
    %258 = vector.extract_strided_slice %257 {offsets = [0, 0], sizes = [8, 32], strides = [1, 1]} : vector<8x128xf32> to vector<8x32xf32>
    %cst_90 = arith.constant 0.000000e+00 : f32
    %259 = vector.broadcast %cst_90 : f32 to vector<8x32xf32>
    %260 = arith.subf %259, %258 : vector<8x32xf32>
    %261 = math.exp %260 : vector<8x32xf32>
    %cst_91 = arith.constant 1.000000e+00 : f32
    %262 = vector.broadcast %cst_91 : f32 to vector<8x32xf32>
    %263 = arith.addf %262, %261 : vector<8x32xf32>
    %cst_92 = arith.constant 1.000000e+00 : f32
    %264 = vector.broadcast %cst_92 : f32 to vector<8x32xf32>
    %265 = arith.divf %264, %263 : vector<8x32xf32>
    %266 = vector.extract_strided_slice %257 {offsets = [0, 32], sizes = [8, 32], strides = [1, 1]} : vector<8x128xf32> to vector<8x32xf32>
    %cst_93 = arith.constant 0.000000e+00 : f32
    %267 = vector.broadcast %cst_93 : f32 to vector<8x32xf32>
    %268 = arith.subf %267, %266 : vector<8x32xf32>
    %269 = math.exp %268 : vector<8x32xf32>
    %cst_94 = arith.constant 1.000000e+00 : f32
    %270 = vector.broadcast %cst_94 : f32 to vector<8x32xf32>
    %271 = arith.addf %270, %269 : vector<8x32xf32>
    %cst_95 = arith.constant 1.000000e+00 : f32
    %272 = vector.broadcast %cst_95 : f32 to vector<8x32xf32>
    %273 = arith.divf %272, %271 : vector<8x32xf32>
    %274 = vector.extract_strided_slice %257 {offsets = [0, 64], sizes = [8, 32], strides = [1, 1]} : vector<8x128xf32> to vector<8x32xf32>
    %275 = math.tanh %274 : vector<8x32xf32>
    %276 = vector.extract_strided_slice %257 {offsets = [0, 96], sizes = [8, 32], strides = [1, 1]} : vector<8x128xf32> to vector<8x32xf32>
    %cst_96 = arith.constant 0.000000e+00 : f32
    %277 = vector.broadcast %cst_96 : f32 to vector<8x32xf32>
    %278 = arith.subf %277, %276 : vector<8x32xf32>
    %279 = math.exp %278 : vector<8x32xf32>
    %cst_97 = arith.constant 1.000000e+00 : f32
    %280 = vector.broadcast %cst_97 : f32 to vector<8x32xf32>
    %281 = arith.addf %280, %279 : vector<8x32xf32>
    %cst_98 = arith.constant 1.000000e+00 : f32
    %282 = vector.broadcast %cst_98 : f32 to vector<8x32xf32>
    %283 = arith.divf %282, %281 : vector<8x32xf32>
    %284 = arith.mulf %273, %252 : vector<8x32xf32>
    %285 = arith.mulf %265, %275 : vector<8x32xf32>
    %286 = arith.addf %284, %285 : vector<8x32xf32>
    %287 = math.tanh %286 : vector<8x32xf32>
    %288 = arith.mulf %283, %287 : vector<8x32xf32>
    %c0_99 = arith.constant 0 : index
    %c0_100 = arith.constant 0 : index
    %289 = vector.load %arg7[%c0_99, %c0_100] : memref<8x32xf32, #tpu.memory_space<vmem>>, vector<8x32xf32>
    tpu.vector_store %arg7[%c0_99, %c0_100], %288 {strides = array<i32>} : memref<8x32xf32, #tpu.memory_space<vmem>>, vector<8x32xf32>,
    return
  }
}

</mosaic_0001>

<bundles_post_ra>
// kernel: lstm_embedding_forward.1
= control target key start
LH: loop header
LB: loop body
LE: loop exit
PB: predicated region body
PF: predicated region fallthrough
CT: control target
= control target key end

     0   :  { %vm31_vm0 = vcmask 261120   ;;  %v757_v10 = vmov 0.0   ;;  %vm91_vm1 = vcmask 64512   ;;  %s963_s3 = inlined_call_operand.vmem [shape: f32[32,128], index: 3, kind: input, shape index: {}]   ;;  %s964_s1 = inlined_call_operand.vmem [shape: f32[8,32], index: 1, kind: input, shape index: {}]   ;;  %s965_s2 = inlined_call_operand.vmem [shape: f32[1,32], index: 2, kind: input, shape index: {}]   ;;  %s966_s5 = inlined_call_operand.vmem [shape: f32[32,128], index: 5, kind: input, shape index: {}]   ;;  %s967_s0 = inlined_call_operand.vmem [shape: f32[64,8], index: 0, kind: input, shape index: {}]   ;;  %s968_s4 = inlined_call_operand.vmem [shape: f32[1,128], index: 4, kind: input, shape index: {}]   ;;  %s969_s6 = inlined_call_operand.vmem [shape: f32[1,128], index: 6, kind: input, shape index: {}]   ;;  %s970_s7 = inlined_call_operand.vmem [shape: f32[8,32], index: 7, kind: output, shape index: {}]  }
   0x1   :  { %v30_v0 = vld [vmem:[%s963_s3 + $0x18] sm:$0xff]  ;;  %v29_v1 = vld [vmem:[%s963_s3 + $0x10] sm:$0xff]  ;;  %v28_v2 = vld [vmem:[%s963_s3 + $0x8] sm:$0xff] }
   0x2   :  { %47 = vmatpush.msra.mxu0 %v30_v0  ;;  %72 = vmatpush.msra.mxu3 %v30_v0  ;;  %v27_v3 = vld [vmem:[%s963_s3] sm:$0xff]  ;;  %v821_v6 = vld [vmem:[%s966_s5 + $0x18] sm:$0xff]  ;;  %v828_v7 = vld [vmem:[%s966_s5 + $0x10] sm:$0xff] }
   0x3   :  { %v26_v4 = vld [vmem:[%s964_s1] sm:$0xff]  ;;  %v835_v8 = vld [vmem:[%s966_s5 + $0x8] sm:$0xff]  ;;  %v85_v12 = vld [vmem:[%s967_s0 + $0x18] sm:$0xff] }
   0x4   :  { %48 = vmatpush.msra.mxu0 %v29_v1  ;;  %73 = vmatpush.msra.mxu3 %v29_v1  ;;  %v55_v5 = vld [vmem:[%s965_s2] sm:$0x1]  ;;  %v83_v14 = vld [vmem:[%s967_s0 + $0x8] sm:$0xff]  ;;  %v84_v16 = vld [vmem:[%s967_s0 + $0x10] sm:$0xff] }
   0x5   :  { %v842_v9 = vld [vmem:[%s966_s5] sm:$0xff]  ;;  %v87_v17 = vld [vmem:[%s967_s0 + $0x28] sm:$0xff]  ;;  %v88_v18 = vld [vmem:[%s967_s0 + $0x30] sm:$0xff] }
   0x6   :  { %49 = vmatpush.msra.mxu0 %v28_v2  ;;  %74 = vmatpush.msra.mxu3 %v28_v2  ;;  %v82_v11 = vld [vmem:[%s967_s0] sm:$0xff]  ;;  %v89_v19 = vld [vmem:[%s967_s0 + $0x38] sm:$0xff] }
   0x7   :  { %v86_v15 = vld [vmem:[%s967_s0 + $0x20] sm:$0xff]  ;;  %s758_s0 = smov 64  }
   0x8   :  { %50 = vmatpush.msra.mxu0 %v27_v3  ;;  %75 = vmatpush.msra.mxu3 %v27_v3  ;;  %v56_v20 = vld [vmem:[%s968_s4] sm:$0x1]  ;;  %s759_s4 = smov 32  }
   0x9   :  { %672 = vmatmul.msk.f32.vlgmr.msra.gmra.mxu0 %vm31_vm0, %v26_v4  ;;  %673 = vmatmul.msk.f32.vlgmr.msra.gmra.mxu3 %vm31_vm0, %v55_v5  ;;  %v80_v23 = vld [vmem:[%s969_s6] sm:$0x1] }
   0xa   :  { %176 = vmatpush.msrb.mxu3 %v821_v6  ;;  %239 = vmatpush.msrb.mxu0 %v821_v6 }
   0xc   :  { %177 = vmatpush.msrb.mxu3 %v828_v7  ;;  %240 = vmatpush.msrb.mxu0 %v828_v7 }
   0xe   :  { %178 = vmatpush.msrb.mxu3 %v835_v8  ;;  %241 = vmatpush.msrb.mxu0 %v835_v8 }
  0x10   :  { %179 = vmatpush.msrb.mxu3 %v842_v9  ;;  %242 = vmatpush.msrb.mxu0 %v842_v9 }
  0x11   :  { %180 = vmatmul.f32.vlgmr.msrb.gmra.mxu3 %v757_v10 }
  0x12   :  { %428 = vmatpush.msra.mxu0 %v821_v6  ;;  %365 = vmatpush.msra.mxu3 %v821_v6 }
  0x14   :  { %429 = vmatpush.msra.mxu0 %v828_v7  ;;  %366 = vmatpush.msra.mxu3 %v828_v7 }
  0x16   :  { %430 = vmatpush.msra.mxu0 %v835_v8  ;;  %367 = vmatpush.msra.mxu3 %v835_v8 }
  0x18   :  { %431 = vmatpush.msra.mxu0 %v842_v9  ;;  %368 = vmatpush.msra.mxu3 %v842_v9 }
  0x1a   :  { %554 = vmatpush.msrb.mxu3 %v821_v6 }
  0x1c   :  { %555 = vmatpush.msrb.mxu3 %v828_v7 }
  0x1e   :  { %556 = vmatpush.msrb.mxu3 %v835_v8 }
  0x20   :  { %557 = vmatpush.msrb.mxu3 %v842_v9 }
  0x86   :  { %v52_v13 = vpop.f32.mrf.mxu0 }
  0x87   :  { %131 = vmatpush.msra.mxu1 %v52_v13  ;;  %689 = vmatpush.msra.mxu2 %v52_v13 }
  0x88   :  { %674 = vmatmul.msk.f32.vlgmr.msra.gmra.mxu1 %vm91_vm1, %v82_v11  ;;  %677 = vmatmul.msk.f32.vlgmr.msra.gmra.mxu2 %vm91_vm1, %v85_v12 }
  0x89   :  { %302 = vmatpush.msrb.mxu1 %v821_v6 }
  0x8b   :  { %303 = vmatpush.msrb.mxu1 %v828_v7 }
  0x8c   :  { %v77_v21 = vpop.f32.mrf.mxu3 }
  0x8d   :  { %304 = vmatpush.msrb.mxu1 %v835_v8  ;;  %v78_v22 = vadd.f32 %v77_v21, %v56_v20 }
  0x8f   :  { %305 = vmatpush.msrb.mxu1 %v842_v9  ;;  %v81_v24 = vadd.f32 %v80_v23, %v78_v22 }
  0x90   :  { %675 = vmatmul.msk.f32.gmra.mxu1 %vm91_vm1, %v83_v14  ;;  %678 = vmatmul.msk.f32.gmra.mxu2 %vm91_vm1, %v86_v15 }
  0x91   :  { %491 = vmatpush.msra.mxu1 %v821_v6  ;;  %v906_v25 = vperm.slane %v81_v24, 0 }
  0x93   :  { %492 = vmatpush.msra.mxu1 %v828_v7 }
  0x94   :  { %v181_v27 = vpop.f32.mrf.mxu3 }
  0x95   :  { %493 = vmatpush.msra.mxu1 %v835_v8 }
  0x97   :  { %494 = vmatpush.msra.mxu1 %v842_v9 }
  0x98   :  { %676 = vmatmul.msk.f32.gmra.mxu1 %vm91_vm1, %v84_v16  ;;  %679 = vmatmul.msk.f32.gmra.mxu2 %vm91_vm1, %v87_v17 }
  0xa0   :  { %680 = vmatmul.msk.f32.gmra.mxu2 %vm91_vm1, %v88_v18 }
  0xa8   :  { %681 = vmatmul.msk.f32.gmra.mxu2 %vm91_vm1, %v89_v19 }
 0x105   :  { %v133_v26 = vpop.f32.mrf.mxu1 }
 0x106   :  { %v134_v28 = vadd.f32 %v133_v26, %v906_v25 }
 0x108   :  { %v184_v29 = vadd.f32 %v181_v27, %v134_v28 }
 0x10a   :  { %693 = vtanh.f32 %v184_v29  ;;  %v185_v31 = vsub.f32 0.0, %v184_v29 }
 0x10c   :  { %v186_v32 = vmul.f32 1.442695, %v185_v31 }
 0x10d   :  { %v136_v54 = vpop.f32.mrf.mxu1 }
 0x10e   :  { %695 = vpow2.f32 %v186_v32  ;;  %v137_v55 = vadd.f32 %v136_v54, %v906_v25 }
 0x110   :  { %v694_v30 = vpop.eup %693 }
 0x111   :  { %207 = vrot.lane.b32.xlu0 %v694_v30, %s758_s0 }
 0x114   :  { %v696_v33 = vpop.eup %695 }
 0x115   :  { %v188_v34 = vadd.f32 1.0, %v696_v33  ;;  %v139_v18 = vpop.f32.mrf.mxu1 }
 0x116   :  { %v140_v19 = vadd.f32 %v139_v18, %v906_v25 }
 0x117   :  { %697 = vrcp.f32 %v188_v34  ;;  %v200_v40 = vand.u32 2147483648, %v188_v34  ;;  %vm194_vm3 = vweird.f32 %v188_v34  ;;  %v198_v41 = vand.u32 2147483647, %v188_v34 }
 0x119   :  { %v201_v43 = vor.u32 1.1754944e-38, %v200_v40  ;;  %vm199_vm5 = vcmp.eq.f32.partialorder %v198_v41, 8.507059e+37 }
 0x11d   :  { %v698_v35 = vpop.eup %697 }
 0x11e   :  { %v190_v36 = vmul.f32 %v698_v35, %v188_v34  ;;  %vm195_vm2 = vweird.f32 %v698_v35 }
 0x11f   :  { %vm196_vm4 = vmor %vm194_vm3, %vm195_vm2 }
 0x120   :  { %v191_v37 = vsub.f32 1.0, %v190_v36 }
 0x122   :  { %v192_v38 = vmul.f32 %v698_v35, %v191_v37 }
 0x124   :  { %v193_v39 = vadd.f32 %v698_v35, %v192_v38 }
 0x126   :  { %v197_v42 = vsel %vm196_vm4, %v698_v35, %v193_v39 }
 0x127   :  { %v202_v45 = vsel %vm199_vm5, %v201_v43, %v197_v42 }
 0x128   :  { %v205_v47 = vmul.f32 0.0, %v202_v45 }
 0x183   :  { %v208_v44 = vpop.permute.xlu0 %207 }
 0x184   :  { %v210_v46 = vmul.f32 %v208_v44, %v202_v45 }
 0x186   :  { %212 = vrot.lane.b32.xlu0 %v210_v46, %s759_s4 }
 0x1f8   :  { %v213_v48 = vpop.permute.xlu0 %212 }
 0x1f9   :  { %v215_v49 = vadd.f32 %v213_v48, %v205_v47  ;;  %v142_v47 = vpop.f32.mrf.mxu2 }
 0x1fa   :  { %v143_v48 = vadd.f32 %v142_v47, %v906_v25 }
 0x1fb   :  { %699 = vtanh.f32 %v215_v49 }
 0x201   :  { %v700_v50 = vpop.eup %699 }
 0x202   :  { %218 = vrot.lane.b32.xlu1 %v700_v50, %s758_s0 }
 0x274   :  { %v219_v51 = vpop.permute.xlu1 %218 }
 0x275   :  { %v221_v52 = vmul.f32 %v219_v51, %v202_v45 }
 0x277   :  { %223 = vrot.lane.b32.xlu1 %v221_v52, %s759_s4 }
 0x2e9   :  { %v224_v53 = vpop.permute.xlu1 %223 }
 0x2ea   :  { %682 = vmatmul.msk.f32.vlgmr.msrb.gmra.mxu0 %vm31_vm0, %v224_v53 }
 0x2eb   :  { %617 = vmatpush.msrb.mxu0 %v821_v6 }
 0x2ed   :  { %618 = vmatpush.msrb.mxu0 %v828_v7 }
 0x2ef   :  { %619 = vmatpush.msrb.mxu0 %v835_v8 }
 0x2f1   :  { %620 = vmatpush.msrb.mxu0 %v842_v9 }
 0x367   :  { %v244_v56 = vpop.f32.mrf.mxu0 }
 0x368   :  { %v247_v57 = vadd.f32 %v244_v56, %v137_v55 }
 0x36a   :  { %701 = vtanh.f32 %v247_v57  ;;  %v248_v59 = vsub.f32 0.0, %v247_v57 }
 0x36c   :  { %v249_v60 = vmul.f32 1.442695, %v248_v59 }
 0x36e   :  { %703 = vpow2.f32 %v249_v60 }
 0x370   :  { %v702_v58 = vpop.eup %701 }
 0x371   :  { %270 = vrot.lane.b32.xlu2 %v702_v58, %s758_s0 }
 0x374   :  { %v704_v61 = vpop.eup %703 }
 0x375   :  { %v251_v62 = vadd.f32 1.0, %v704_v61 }
 0x377   :  { %705 = vrcp.f32 %v251_v62  ;;  %v263_v4 = vand.u32 2147483648, %v251_v62  ;;  %vm257_vm7 = vweird.f32 %v251_v62  ;;  %v261_v5 = vand.u32 2147483647, %v251_v62 }
 0x379   :  { %v264_v7 = vor.u32 1.1754944e-38, %v263_v4  ;;  %vm262_vm9 = vcmp.eq.f32.partialorder %v261_v5, 8.507059e+37 }
 0x37d   :  { %v706_v63 = vpop.eup %705 }
 0x37e   :  { %v253_v0 = vmul.f32 %v706_v63, %v251_v62  ;;  %vm258_vm6 = vweird.f32 %v706_v63 }
 0x37f   :  { %vm259_vm8 = vmor %vm257_vm7, %vm258_vm6 }
 0x380   :  { %v254_v1 = vsub.f32 1.0, %v253_v0 }
 0x382   :  { %v255_v2 = vmul.f32 %v706_v63, %v254_v1 }
 0x384   :  { %v256_v3 = vadd.f32 %v706_v63, %v255_v2 }
 0x386   :  { %v260_v6 = vsel %vm259_vm8, %v706_v63, %v256_v3 }
 0x387   :  { %v265_v9 = vsel %vm262_vm9, %v264_v7, %v260_v6 }
 0x388   :  { %v268_v11 = vmul.f32 %v265_v9, %v215_v49 }
 0x3cb   :  { %v271_v8 = vpop.permute.xlu2 %270 }
 0x3cc   :  { %v273_v10 = vmul.f32 %v271_v8, %v265_v9 }
 0x3ce   :  { %275 = vrot.lane.b32.xlu2 %v273_v10, %s759_s4 }
 0x428   :  { %v276_v12 = vpop.permute.xlu2 %275 }
 0x429   :  { %v278_v13 = vadd.f32 %v276_v12, %v268_v11  ;;  %v145_v11 = vpop.f32.mrf.mxu2 }
 0x42a   :  { %v146_v12 = vadd.f32 %v145_v11, %v906_v25 }
 0x42b   :  { %707 = vtanh.f32 %v278_v13 }
 0x431   :  { %v708_v14 = vpop.eup %707 }
 0x432   :  { %281 = vrot.lane.b32.xlu0 %v708_v14, %s758_s0 }
 0x4a4   :  { %v282_v15 = vpop.permute.xlu0 %281 }
 0x4a5   :  { %v284_v16 = vmul.f32 %v282_v15, %v265_v9 }
 0x4a7   :  { %286 = vrot.lane.b32.xlu1 %v284_v16, %s759_s4 }
 0x519   :  { %v287_v17 = vpop.permute.xlu1 %286 }
 0x51a   :  { %683 = vmatmul.msk.f32.vlgmr.msrb.gmra.mxu1 %vm31_vm0, %v287_v17 }
 0x597   :  { %v307_v20 = vpop.f32.mrf.mxu1 }
 0x598   :  { %v310_v21 = vadd.f32 %v307_v20, %v140_v19 }
 0x59a   :  { %709 = vtanh.f32 %v310_v21  ;;  %v311_v23 = vsub.f32 0.0, %v310_v21 }
 0x59c   :  { %v312_v24 = vmul.f32 1.442695, %v311_v23 }
 0x59e   :  { %711 = vpow2.f32 %v312_v24 }
 0x5a0   :  { %v710_v22 = vpop.eup %709 }
 0x5a1   :  { %333 = vrot.lane.b32.xlu2 %v710_v22, %s758_s0 }
 0x5a4   :  { %v712_v26 = vpop.eup %711 }
 0x5a5   :  { %v314_v27 = vadd.f32 1.0, %v712_v26 }
 0x5a7   :  { %713 = vrcp.f32 %v314_v27  ;;  %v326_v33 = vand.u32 2147483648, %v314_v27  ;;  %vm320_vm11 = vweird.f32 %v314_v27  ;;  %v324_v34 = vand.u32 2147483647, %v314_v27 }
 0x5a9   :  { %v327_v36 = vor.u32 1.1754944e-38, %v326_v33  ;;  %vm325_vm13 = vcmp.eq.f32.partialorder %v324_v34, 8.507059e+37 }
 0x5ad   :  { %v714_v28 = vpop.eup %713 }
 0x5ae   :  { %v316_v29 = vmul.f32 %v714_v28, %v314_v27  ;;  %vm321_vm10 = vweird.f32 %v714_v28 }
 0x5af   :  { %vm322_vm12 = vmor %vm320_vm11, %vm321_vm10 }
 0x5b0   :  { %v317_v30 = vsub.f32 1.0, %v316_v29 }
 0x5b2   :  { %v318_v31 = vmul.f32 %v714_v28, %v317_v30 }
 0x5b4   :  { %v319_v32 = vadd.f32 %v714_v28, %v318_v31 }
 0x5b6   :  { %v323_v35 = vsel %vm322_vm12, %v714_v28, %v319_v32 }
 0x5b7   :  { %v328_v38 = vsel %vm325_vm13, %v327_v36, %v323_v35 }
 0x5b8   :  { %v331_v40 = vmul.f32 %v328_v38, %v278_v13 }
 0x5fb   :  { %v334_v37 = vpop.permute.xlu2 %333 }
 0x5fc   :  { %v336_v39 = vmul.f32 %v334_v37, %v328_v38 }
 0x5fe   :  { %338 = vrot.lane.b32.xlu0 %v336_v39, %s759_s4 }
 0x670   :  { %v339_v41 = vpop.permute.xlu0 %338 }
 0x671   :  { %v341_v42 = vadd.f32 %v339_v41, %v331_v40  ;;  %v148_v40 = vpop.f32.mrf.mxu2 }
 0x672   :  { %v149_v41 = vadd.f32 %v148_v40, %v906_v25 }
 0x673   :  { %715 = vtanh.f32 %v341_v42 }
 0x679   :  { %v716_v43 = vpop.eup %715 }
 0x67a   :  { %344 = vrot.lane.b32.xlu1 %v716_v43, %s758_s0 }
 0x6ec   :  { %v345_v44 = vpop.permute.xlu1 %344 }
 0x6ed   :  { %v347_v45 = vmul.f32 %v345_v44, %v328_v38 }
 0x6ef   :  { %349 = vrot.lane.b32.xlu2 %v347_v45, %s759_s4 }
 0x749   :  { %v350_v46 = vpop.permute.xlu2 %349 }
 0x74a   :  { %684 = vmatmul.msk.f32.vlgmr.msra.gmra.mxu3 %vm31_vm0, %v350_v46 }
 0x7cd   :  { %v370_v49 = vpop.f32.mrf.mxu3 }
 0x7ce   :  { %v373_v50 = vadd.f32 %v370_v49, %v143_v48 }
 0x7d0   :  { %717 = vtanh.f32 %v373_v50  ;;  %v374_v52 = vsub.f32 0.0, %v373_v50 }
 0x7d2   :  { %v375_v53 = vmul.f32 1.442695, %v374_v52 }
 0x7d4   :  { %719 = vpow2.f32 %v375_v53 }
 0x7d6   :  { %v718_v51 = vpop.eup %717 }
 0x7d7   :  { %396 = vrot.lane.b32.xlu0 %v718_v51, %s758_s0 }
 0x7da   :  { %v720_v54 = vpop.eup %719 }
 0x7db   :  { %v377_v55 = vadd.f32 1.0, %v720_v54 }
 0x7dd   :  { %721 = vrcp.f32 %v377_v55  ;;  %v389_v61 = vand.u32 2147483648, %v377_v55  ;;  %vm383_vm15 = vweird.f32 %v377_v55  ;;  %v387_v62 = vand.u32 2147483647, %v377_v55 }
 0x7df   :  { %v390_v0 = vor.u32 1.1754944e-38, %v389_v61  ;;  %vm388_vm2 = vcmp.eq.f32.partialorder %v387_v62, 8.507059e+37 }
 0x7e3   :  { %v722_v56 = vpop.eup %721 }
 0x7e4   :  { %v379_v57 = vmul.f32 %v722_v56, %v377_v55  ;;  %vm384_vm14 = vweird.f32 %v722_v56 }
 0x7e5   :  { %vm385_vm1 = vmor %vm383_vm15, %vm384_vm14 }
 0x7e6   :  { %v380_v58 = vsub.f32 1.0, %v379_v57 }
 0x7e8   :  { %v381_v59 = vmul.f32 %v722_v56, %v380_v58 }
 0x7ea   :  { %v382_v60 = vadd.f32 %v722_v56, %v381_v59 }
 0x7ec   :  { %v386_v63 = vsel %vm385_vm1, %v722_v56, %v382_v60 }
 0x7ed   :  { %v391_v2 = vsel %vm388_vm2, %v390_v0, %v386_v63 }
 0x7ee   :  { %v394_v4 = vmul.f32 %v391_v2, %v341_v42 }
 0x849   :  { %v397_v1 = vpop.permute.xlu0 %396 }
 0x84a   :  { %v399_v3 = vmul.f32 %v397_v1, %v391_v2 }
 0x84c   :  { %401 = vrot.lane.b32.xlu1 %v399_v3, %s759_s4 }
 0x8be   :  { %v402_v5 = vpop.permute.xlu1 %401 }
 0x8bf   :  { %v404_v6 = vadd.f32 %v402_v5, %v394_v4  ;;  %v151_v4 = vpop.f32.mrf.mxu2 }
 0x8c0   :  { %v152_v5 = vadd.f32 %v151_v4, %v906_v25 }
 0x8c1   :  { %723 = vtanh.f32 %v404_v6 }
 0x8c7   :  { %v724_v7 = vpop.eup %723 }
 0x8c8   :  { %407 = vrot.lane.b32.xlu2 %v724_v7, %s758_s0 }
 0x922   :  { %v408_v8 = vpop.permute.xlu2 %407 }
 0x923   :  { %v410_v9 = vmul.f32 %v408_v8, %v391_v2 }
 0x925   :  { %412 = vrot.lane.b32.xlu0 %v410_v9, %s759_s4 }
 0x997   :  { %v413_v10 = vpop.permute.xlu0 %412 }
 0x998   :  { %685 = vmatmul.msk.f32.vlgmr.msra.gmra.mxu0 %vm31_vm0, %v413_v10 }
 0xa15   :  { %v433_v13 = vpop.f32.mrf.mxu0 }
 0xa16   :  { %v436_v14 = vadd.f32 %v433_v13, %v146_v12 }
 0xa18   :  { %725 = vtanh.f32 %v436_v14  ;;  %v437_v16 = vsub.f32 0.0, %v436_v14 }
 0xa1a   :  { %v438_v17 = vmul.f32 1.442695, %v437_v16 }
 0xa1c   :  { %727 = vpow2.f32 %v438_v17 }
 0xa1e   :  { %v726_v15 = vpop.eup %725 }
 0xa1f   :  { %459 = vrot.lane.b32.xlu1 %v726_v15, %s758_s0 }
 0xa22   :  { %v728_v18 = vpop.eup %727 }
 0xa23   :  { %v440_v19 = vadd.f32 1.0, %v728_v18 }
 0xa25   :  { %729 = vrcp.f32 %v440_v19  ;;  %v452_v26 = vand.u32 2147483648, %v440_v19  ;;  %vm446_vm4 = vweird.f32 %v440_v19  ;;  %v450_v27 = vand.u32 2147483647, %v440_v19 }
 0xa27   :  { %v453_v29 = vor.u32 1.1754944e-38, %v452_v26  ;;  %vm451_vm6 = vcmp.eq.f32.partialorder %v450_v27, 8.507059e+37 }
 0xa2b   :  { %v730_v20 = vpop.eup %729 }
 0xa2c   :  { %v442_v21 = vmul.f32 %v730_v20, %v440_v19  ;;  %vm447_vm3 = vweird.f32 %v730_v20 }
 0xa2d   :  { %vm448_vm5 = vmor %vm446_vm4, %vm447_vm3 }
 0xa2e   :  { %v443_v22 = vsub.f32 1.0, %v442_v21 }
 0xa30   :  { %v444_v23 = vmul.f32 %v730_v20, %v443_v22 }
 0xa32   :  { %v445_v24 = vadd.f32 %v730_v20, %v444_v23 }
 0xa34   :  { %v449_v28 = vsel %vm448_vm5, %v730_v20, %v445_v24 }
 0xa35   :  { %v454_v31 = vsel %vm451_vm6, %v453_v29, %v449_v28 }
 0xa36   :  { %v457_v33 = vmul.f32 %v454_v31, %v404_v6 }
 0xa91   :  { %v460_v30 = vpop.permute.xlu1 %459 }
 0xa92   :  { %v462_v32 = vmul.f32 %v460_v30, %v454_v31 }
 0xa94   :  { %464 = vrot.lane.b32.xlu2 %v462_v32, %s759_s4 }
 0xaee   :  { %v465_v34 = vpop.permute.xlu2 %464 }
 0xaef   :  { %v467_v35 = vadd.f32 %v465_v34, %v457_v33  ;;  %v154_v33 = vpop.f32.mrf.mxu2 }
 0xaf0   :  { %v155_v34 = vadd.f32 %v154_v33, %v906_v25 }
 0xaf1   :  { %731 = vtanh.f32 %v467_v35 }
 0xaf7   :  { %v732_v36 = vpop.eup %731 }
 0xaf8   :  { %470 = vrot.lane.b32.xlu0 %v732_v36, %s758_s0 }
 0xb6a   :  { %v471_v37 = vpop.permute.xlu0 %470 }
 0xb6b   :  { %v473_v38 = vmul.f32 %v471_v37, %v454_v31 }
 0xb6d   :  { %475 = vrot.lane.b32.xlu1 %v473_v38, %s759_s4 }
 0xbdf   :  { %v476_v39 = vpop.permute.xlu1 %475 }
 0xbe0   :  { %686 = vmatmul.msk.f32.vlgmr.msra.gmra.mxu1 %vm31_vm0, %v476_v39 }
 0xc5d   :  { %v496_v42 = vpop.f32.mrf.mxu1 }
 0xc5e   :  { %v499_v43 = vadd.f32 %v496_v42, %v149_v41 }
 0xc60   :  { %733 = vtanh.f32 %v499_v43  ;;  %v500_v45 = vsub.f32 0.0, %v499_v43 }
 0xc62   :  { %v501_v46 = vmul.f32 1.442695, %v500_v45 }
 0xc64   :  { %735 = vpow2.f32 %v501_v46 }
 0xc66   :  { %v734_v44 = vpop.eup %733 }
 0xc67   :  { %522 = vrot.lane.b32.xlu2 %v734_v44, %s758_s0 }
 0xc6a   :  { %v736_v47 = vpop.eup %735 }
 0xc6b   :  { %v503_v48 = vadd.f32 1.0, %v736_v47 }
 0xc6d   :  { %737 = vrcp.f32 %v503_v48  ;;  %v515_v54 = vand.u32 2147483648, %v503_v48  ;;  %vm509_vm8 = vweird.f32 %v503_v48  ;;  %v513_v55 = vand.u32 2147483647, %v503_v48 }
 0xc6f   :  { %v516_v57 = vor.u32 1.1754944e-38, %v515_v54  ;;  %vm514_vm10 = vcmp.eq.f32.partialorder %v513_v55, 8.507059e+37 }
 0xc73   :  { %v738_v49 = vpop.eup %737 }
 0xc74   :  { %v505_v50 = vmul.f32 %v738_v49, %v503_v48  ;;  %vm510_vm7 = vweird.f32 %v738_v49 }
 0xc75   :  { %vm511_vm9 = vmor %vm509_vm8, %vm510_vm7 }
 0xc76   :  { %v506_v51 = vsub.f32 1.0, %v505_v50 }
 0xc78   :  { %v507_v52 = vmul.f32 %v738_v49, %v506_v51 }
 0xc7a   :  { %v508_v53 = vadd.f32 %v738_v49, %v507_v52 }
 0xc7c   :  { %v512_v56 = vsel %vm511_vm9, %v738_v49, %v508_v53 }
 0xc7d   :  { %v517_v59 = vsel %vm514_vm10, %v516_v57, %v512_v56 }
 0xc7e   :  { %v520_v61 = vmul.f32 %v517_v59, %v467_v35 }
 0xcc1   :  { %v523_v58 = vpop.permute.xlu2 %522 }
 0xcc2   :  { %v525_v60 = vmul.f32 %v523_v58, %v517_v59 }
 0xcc4   :  { %527 = vrot.lane.b32.xlu0 %v525_v60, %s759_s4 }
 0xd36   :  { %v528_v62 = vpop.permute.xlu0 %527 }
 0xd37   :  { %v530_v63 = vadd.f32 %v528_v62, %v520_v61 }
 0xd39   :  { %739 = vtanh.f32 %v530_v63 }
 0xd3f   :  { %v740_v0 = vpop.eup %739 }
 0xd40   :  { %533 = vrot.lane.b32.xlu1 %v740_v0, %s758_s0 }
 0xdb2   :  { %v534_v1 = vpop.permute.xlu1 %533 }
 0xdb3   :  { %v536_v2 = vmul.f32 %v534_v1, %v517_v59 }
 0xdb5   :  { %538 = vrot.lane.b32.xlu2 %v536_v2, %s759_s4 }
 0xe0f   :  { %v539_v3 = vpop.permute.xlu2 %538 }
 0xe10   :  { %687 = vmatmul.msk.f32.vlgmr.msrb.gmra.mxu3 %vm31_vm0, %v539_v3 }
 0xe93   :  { %v559_v6 = vpop.f32.mrf.mxu3 }
 0xe94   :  { %v562_v7 = vadd.f32 %v559_v6, %v152_v5 }
 0xe96   :  { %741 = vtanh.f32 %v562_v7  ;;  %v563_v9 = vsub.f32 0.0, %v562_v7 }
 0xe98   :  { %v564_v10 = vmul.f32 1.442695, %v563_v9 }
 0xe9a   :  { %743 = vpow2.f32 %v564_v10 }
 0xe9c   :  { %v742_v8 = vpop.eup %741 }
 0xe9d   :  { %585 = vrot.lane.b32.xlu0 %v742_v8, %s758_s0 }
 0xea0   :  { %v744_v11 = vpop.eup %743 }
 0xea1   :  { %v566_v12 = vadd.f32 1.0, %v744_v11 }
 0xea3   :  { %745 = vrcp.f32 %v566_v12  ;;  %v578_v18 = vand.u32 2147483648, %v566_v12  ;;  %vm572_vm12 = vweird.f32 %v566_v12  ;;  %v576_v19 = vand.u32 2147483647, %v566_v12 }
 0xea5   :  { %v579_v21 = vor.u32 1.1754944e-38, %v578_v18  ;;  %vm577_vm14 = vcmp.eq.f32.partialorder %v576_v19, 8.507059e+37 }
 0xea9   :  { %v746_v13 = vpop.eup %745 }
 0xeaa   :  { %v568_v14 = vmul.f32 %v746_v13, %v566_v12  ;;  %vm573_vm11 = vweird.f32 %v746_v13 }
 0xeab   :  { %vm574_vm13 = vmor %vm572_vm12, %vm573_vm11 }
 0xeac   :  { %v569_v15 = vsub.f32 1.0, %v568_v14 }
 0xeae   :  { %v570_v16 = vmul.f32 %v746_v13, %v569_v15 }
 0xeb0   :  { %v571_v17 = vadd.f32 %v746_v13, %v570_v16 }
 0xeb2   :  { %v575_v20 = vsel %vm574_vm13, %v746_v13, %v571_v17 }
 0xeb3   :  { %v580_v23 = vsel %vm577_vm14, %v579_v21, %v575_v20 }
 0xeb4   :  { %v583_v26 = vmul.f32 %v580_v23, %v530_v63 }
 0xf0f   :  { %v586_v22 = vpop.permute.xlu0 %585 }
 0xf10   :  { %v588_v24 = vmul.f32 %v586_v22, %v580_v23 }
 0xf12   :  { %590 = vrot.lane.b32.xlu1 %v588_v24, %s759_s4 }
 0xf84   :  { %v591_v27 = vpop.permute.xlu1 %590 }
 0xf85   :  { %v593_v28 = vadd.f32 %v591_v27, %v583_v26 }
 0xf87   :  { %747 = vtanh.f32 %v593_v28 }
 0xf8d   :  { %v748_v29 = vpop.eup %747 }
 0xf8e   :  { %596 = vrot.lane.b32.xlu2 %v748_v29, %s758_s0 }
 0xfe8   :  { %v597_v30 = vpop.permute.xlu2 %596 }
 0xfe9   :  { %v599_v31 = vmul.f32 %v597_v30, %v580_v23 }
 0xfeb   :  { %601 = vrot.lane.b32.xlu0 %v599_v31, %s759_s4 }
0x105d   :  { %v602_v32 = vpop.permute.xlu0 %601 }
0x105e   :  { %688 = vmatmul.msk.f32.vlgmr.msrb.gmra.mxu0 %vm31_vm0, %v602_v32 }
0x10db   :  { %v622_v35 = vpop.f32.mrf.mxu0 }
0x10dc   :  { %v625_v36 = vadd.f32 %v622_v35, %v155_v34 }
0x10de   :  { %749 = vtanh.f32 %v625_v36  ;;  %v626_v38 = vsub.f32 0.0, %v625_v36 }
0x10e0   :  { %v627_v39 = vmul.f32 1.442695, %v626_v38 }
0x10e2   :  { %751 = vpow2.f32 %v627_v39 }
0x10e4   :  { %v750_v37 = vpop.eup %749 }
0x10e5   :  { %648 = vrot.lane.b32.xlu1 %v750_v37, %s758_s0 }
0x10e8   :  { %v752_v40 = vpop.eup %751 }
0x10e9   :  { %v629_v41 = vadd.f32 1.0, %v752_v40 }
0x10eb   :  { %753 = vrcp.f32 %v629_v41  ;;  %v641_v47 = vand.u32 2147483648, %v629_v41  ;;  %vm635_vm1 = vweird.f32 %v629_v41  ;;  %v639_v25 = vand.u32 2147483647, %v629_v41 }
0x10ed   :  { %v642_v49 = vor.u32 1.1754944e-38, %v641_v47  ;;  %vm640_vm3 = vcmp.eq.f32.partialorder %v639_v25, 8.507059e+37 }
0x10f1   :  { %v754_v42 = vpop.eup %753 }
0x10f2   :  { %v631_v43 = vmul.f32 %v754_v42, %v629_v41  ;;  %vm636_vm15 = vweird.f32 %v754_v42 }
0x10f3   :  { %vm637_vm2 = vmor %vm635_vm1, %vm636_vm15 }
0x10f4   :  { %v632_v44 = vsub.f32 1.0, %v631_v43 }
0x10f6   :  { %v633_v45 = vmul.f32 %v754_v42, %v632_v44 }
0x10f8   :  { %v634_v46 = vadd.f32 %v754_v42, %v633_v45 }
0x10fa   :  { %v638_v48 = vsel %vm637_vm2, %v754_v42, %v634_v46 }
0x10fb   :  { %v643_v51 = vsel %vm640_vm3, %v642_v49, %v638_v48 }
0x10fc   :  { %v646_v53 = vmul.f32 %v643_v51, %v593_v28 }
0x1157   :  { %v649_v50 = vpop.permute.xlu1 %648 }
0x1158   :  { %v651_v52 = vmul.f32 %v649_v50, %v643_v51 }
0x115a   :  { %653 = vrot.lane.b32.xlu2 %v651_v52, %s759_s4 }
0x11b4   :  { %v654_v54 = vpop.permute.xlu2 %653 }
0x11b5   :  { %v656_v55 = vadd.f32 %v654_v54, %v646_v53 }
0x11b7   :  { %755 = vtanh.f32 %v656_v55 }
0x11bd   :  { %v756_v56 = vpop.eup %755 }
0x11be   :  { %659 = vrot.lane.b32.xlu0 %v756_v56, %s758_s0 }
0x1230   :  { %v660_v57 = vpop.permute.xlu0 %659 }
0x1231   :  { %v662_v58 = vmul.f32 %v660_v57, %v643_v51 }
0x1233   :  { %664 = vrot.lane.b32.xlu1 %v662_v58, %s759_s4 }
0x12a5   :  { %v665_v59 = vpop.permute.xlu1 %664 }
0x12a6   :  { %667 = vst.msk [vmem:[%s970_s7] sm:$0xff] %vm31_vm0, %v665_v59 }

</bundles_post_ra>
